<compile_context>
chip_gen: v6e
topology: v6e:2x2x1
jax: 0.10.0
libtpu: 0.0.40
codegen_flags: <defaults>
</compile_context>

<pallas_src>
import functools

import jax
import jax.numpy as jnp
from jax.experimental import pallas as pl
from jax.experimental.pallas import tpu as pltpu


def _round_up(a, m):
    return ((a + m - 1) // m) * m


def _kfc_kernel(xn_ref, x_ref, cn_ref, xt_ref, wt_ref, b_ref, o_ref, acc_ref,
                *, gamma):
    """One (batch_tile, n_out_tile) output block, accumulated over n_in tiles.

    xn_ref : (tb, 1)   f32   ||x_b||^2 / (2 sigma^2)   (precomputed)
    x_ref  : (tb, Dp)  bf16  input batch tile (resident across j, k)
    cn_ref : (1, tn)   f32   ||X_i||^2 / (2 sigma^2)   (precomputed)
    xt_ref : (Dp, tn)  bf16  X^T tile (centers)
    wt_ref : (tn, to)  bf16  W^T tile
    b_ref  : (1, to)   f32   bias tile
    o_ref  : (tb, to)        output tile (same block across k)
    acc_ref: (tb, to)  f32   VMEM accumulator scratch
    """
    k = pl.program_id(2)

    @pl.when(k == 0)
    def _init():
        acc_ref[...] = jnp.zeros_like(acc_ref)

    # <x_b, X_i> for this (batch, n_in) tile: bf16 MXU dot, f32 accumulate.
    cross = jnp.dot(x_ref[...], xt_ref[...],
                    preferred_element_type=jnp.float32)          # (tb, tn)

    # -||x - X||^2 / (2 sigma^2) = gamma*<x,X> - ||x||^2/(2s^2) - ||X||^2/(2s^2)
    arg = cross * gamma - xn_ref[...] - cn_ref[...]
    arg = jnp.minimum(arg, 0.0)     # guard tiny positives from cancellation
    phi = jnp.exp(arg)              # Gaussian kernel features (EUP slot), f32

    # Linear layer: accumulate phi @ W^T over the n_in reduction axis.
    acc_ref[...] += jnp.dot(phi.astype(wt_ref.dtype), wt_ref[...],
                            preferred_element_type=jnp.float32)

    @pl.when(k == pl.num_programs(2) - 1)
    def _finalize():
        o_ref[...] = (acc_ref[...] + b_ref[...]).astype(o_ref.dtype)


def k_fully_connected(x, X, W, b, sigma=1.0, *,
                      block_b=256, block_n_in=512, block_n_out=512,
                      mxu_dtype=jnp.bfloat16):
    """Pallas forward of kFullyConnected.

    x : (batch, dim)
    X : (n_in, dim)    centers
    W : (n_out, n_in)  linear weight (PyTorch convention)
    b : (n_out,)       bias
    """
    B, D = x.shape
    N, D2 = X.shape
    n_out = W.shape[0]
    assert D2 == D and W.shape == (n_out, N) and b.shape == (n_out,)

    inv_two_sigma_sq = 1.0 / (2.0 * float(sigma) ** 2)
    gamma = 2.0 * inv_two_sigma_sq        # scale applied to the MXU cross term

    # Tile sizes, clipped to the (padded) problem and kept hardware-aligned.
    sub = 16 if mxu_dtype == jnp.bfloat16 else 8
    tb = min(block_b, _round_up(B, sub))
    tn = min(block_n_in, _round_up(N, 128))
    to = min(block_n_out, _round_up(n_out, 128))
    Bp = _round_up(B, tb)
    Np = _round_up(N, tn)
    Op = _round_up(n_out, to)
    Dp = _round_up(D, 128)

    # Hoisted constant prep: scaled squared norms (f32), transposes, padding.
    xf = x.astype(jnp.float32)
    Xf = X.astype(jnp.float32)
    xn = jnp.sum(xf * xf, axis=-1, keepdims=True) * inv_two_sigma_sq   # (B, 1)
    cn = (jnp.sum(Xf * Xf, axis=-1) * inv_two_sigma_sq)[None, :]       # (1, N)

    def pad2(a, r, c):
        return jnp.pad(a, ((0, r - a.shape[0]), (0, c - a.shape[1])))

    x_p = pad2(x.astype(mxu_dtype), Bp, Dp)            # (Bp, Dp)
    xt_p = pad2(X.T.astype(mxu_dtype), Dp, Np)         # (Dp, Np)
    wt_p = pad2(W.T.astype(mxu_dtype), Np, Op)         # (Np, Op) zero pad rows/cols
    xn_p = pad2(xn, Bp, 1)                             # (Bp, 1)
    cn_p = pad2(cn, 1, Np)                             # (1, Np)
    b_p = pad2(b.astype(jnp.float32)[None, :], 1, Op)  # (1, Op)

    grid = (Bp // tb, Op // to, Np // tn)
    kernel = functools.partial(_kfc_kernel, gamma=gamma)

    out = pl.pallas_call(
        kernel,
        out_shape=jax.ShapeDtypeStruct((Bp, Op), x.dtype),
        grid=grid,
        in_specs=[
            pl.BlockSpec((tb, 1), lambda i, j, k: (i, 0)),    # scaled ||x||^2
            pl.BlockSpec((tb, Dp), lambda i, j, k: (i, 0)),   # x tile (resident over j, k)
            pl.BlockSpec((1, tn), lambda i, j, k: (0, k)),    # scaled ||X||^2
            pl.BlockSpec((Dp, tn), lambda i, j, k: (0, k)),   # X^T tile
            pl.BlockSpec((tn, to), lambda i, j, k: (k, j)),   # W^T tile
            pl.BlockSpec((1, to), lambda i, j, k: (0, j)),    # bias
        ],
        out_specs=pl.BlockSpec((tb, to), lambda i, j, k: (i, j)),
        scratch_shapes=[pltpu.VMEM((tb, to), jnp.float32)],
        compiler_params=pltpu.CompilerParams(
            dimension_semantics=("parallel", "parallel", "arbitrary")),
    )(xn_p, x_p, cn_p, xt_p, wt_p, b_p)

    return out[:B, :n_out]


def _reference(x, X, W, b, sigma=1.0):
    """Pure-JAX reference mirroring the PyTorch module."""
    d = jnp.sum((x[:, None, :] - X[None, :, :]) ** 2, axis=-1)
    phi = jnp.exp(-d / (2.0 * sigma ** 2))
    return phi @ W.T + b


def _run_case(batch, dim, n_in, n_out, sigma, **tile_kwargs):
    ks = jax.random.split(jax.random.PRNGKey(0), 4)
    x = jax.random.normal(ks[0], (batch, dim), dtype=jnp.float32)
    X = jax.random.normal(ks[1], (n_in, dim), dtype=jnp.float32)
    bound = 1.0 / (n_in ** 0.5)            # PyTorch-like Linear init bound
    W = jax.random.uniform(ks[2], (n_out, n_in), minval=-bound, maxval=bound,
                           dtype=jnp.float32)
    b = jax.random.uniform(ks[3], (n_out,), minval=-bound, maxval=bound,
                           dtype=jnp.float32)

    y = jax.block_until_ready(
        k_fully_connected(x, X, W, b, sigma=sigma, **tile_kwargs))
    y_ref = _reference(x, X, W, b, sigma=sigma)

    assert y.shape == (batch, n_out)
    # bf16 MXU operands (f32 accumulate) -> slightly looser tolerance than f32.
    assert jnp.allclose(y, y_ref, atol=2e-2, rtol=2e-2), (
        f"mismatch vs reference: max abs err "
        f"{float(jnp.max(jnp.abs(y - y_ref)))}")


if __name__ == "__main__":
    # Small single-tile case (whole problem fits one grid step after padding).
    _run_case(batch=8, dim=32, n_in=16, n_out=24, sigma=32.0 ** 0.5)

    # Multi-tile case exercising the (batch, n_out, n_in) grid, the n_in
    # reduction accumulator and the zero-padding paths (all dims unaligned).
    _run_case(batch=24, dim=40, n_in=300, n_out=200, sigma=40.0 ** 0.5,
              block_b=16, block_n_in=128, block_n_out=128)

    print("KERNEL_OK")
</pallas_src>

<mosaic_0001>
module attributes {stable_mosaic.version = 11 : i64} {
  func.func @_kfc_kernel(%arg0: i32, %arg1: i32, %arg2: i32, %arg3: memref<16x1xf32, #tpu.memory_space<vmem>>, %arg4: memref<16x128xbf16, #tpu.memory_space<vmem>>, %arg5: memref<1x128xf32, #tpu.memory_space<vmem>>, %arg6: memref<128x128xbf16, #tpu.memory_space<vmem>>, %arg7: memref<128x128xbf16, #tpu.memory_space<vmem>>, %arg8: memref<1x128xf32, #tpu.memory_space<vmem>>, %arg9: memref<16x128xf32, #tpu.memory_space<vmem>>, %arg10: memref<16x128xf32, #tpu.memory_space<vmem>>) attributes {dimension_semantics = [#tpu.dimension_semantics<parallel>, #tpu.dimension_semantics<parallel>, #tpu.dimension_semantics<arbitrary>], iteration_bounds = array<i64: 1, 1, 1>, scalar_prefetch = 0 : i64, scratch_operands = 1 : i64, tpu.core_type = #tpu.core_type<tc>, window_params = [{transform_indices = @transform_0, window_bounds = array<i64: 16, 1>}, {transform_indices = @transform_1, window_bounds = array<i64: 16, 128>}, {transform_indices = @transform_2, window_bounds = array<i64: 1, 128>}, {transform_indices = @transform_3, window_bounds = array<i64: 128, 128>}, {transform_indices = @transform_4, window_bounds = array<i64: 128, 128>}, {transform_indices = @transform_5, window_bounds = array<i64: 1, 128>}, {transform_indices = @transform_6, window_bounds = array<i64: 16, 128>}]} {
    %c0_i32 = arith.constant 0 : i32
    %0 = arith.cmpi eq, %arg2, %c0_i32 : i32
    %1 = arith.extui %0 : i1 to i32
    %c0_i32_0 = arith.constant 0 : i32
    %2 = arith.cmpi ne, %1, %c0_i32_0 : i32
    scf.if %2 {
      %cst_19 = arith.constant 0.000000e+00 : f32
      %26 = vector.broadcast %cst_19 : f32 to vector<16x128xf32>
      %c0_20 = arith.constant 0 : index
      %c0_21 = arith.constant 0 : index
      %27 = vector.load %arg10[%c0_20, %c0_21] : memref<16x128xf32, #tpu.memory_space<vmem>>, vector<16x128xf32>
      tpu.vector_store %arg10[%c0_20, %c0_21], %26 {strides = array<i32>} : memref<16x128xf32, #tpu.memory_space<vmem>>, vector<16x128xf32>,
    } else {
    }
    %c0 = arith.constant 0 : index
    %c0_1 = arith.constant 0 : index
    %3 = vector.load %arg4[%c0, %c0_1] : memref<16x128xbf16, #tpu.memory_space<vmem>>, vector<16x128xbf16>
    %c0_2 = arith.constant 0 : index
    %c0_3 = arith.constant 0 : index
    %4 = vector.load %arg6[%c0_2, %c0_3] : memref<128x128xbf16, #tpu.memory_space<vmem>>, vector<128x128xbf16>
    %cst = arith.constant dense<0.000000e+00> : vector<16x128xf32>
    %5 = tpu.matmul %3, %4, %cst {dimension_numbers = #tpu.dot_dimension_numbers<[1], [0], [0], [1], [0, 0, 1, 1], [], []>} : vector<16x128xbf16>, vector<128x128xbf16>, vector<16x128xf32> -> vector<16x128xf32>
    %cst_4 = arith.constant 3.125000e-02 : f32
    %6 = vector.broadcast %cst_4 : f32 to vector<16x128xf32>
    %7 = arith.mulf %5, %6 : vector<16x128xf32>
    %c0_5 = arith.constant 0 : index
    %c0_6 = arith.constant 0 : index
    %8 = vector.load %arg3[%c0_5, %c0_6] : memref<16x1xf32, #tpu.memory_space<vmem>>, vector<16x1xf32>
    %9 = vector.broadcast %8 : vector<16x1xf32> to vector<16x128xf32>
    %10 = arith.subf %7, %9 : vector<16x128xf32>
    %c0_7 = arith.constant 0 : index
    %c0_8 = arith.constant 0 : index
    %11 = vector.load %arg5[%c0_7, %c0_8] : memref<1x128xf32, #tpu.memory_space<vmem>>, vector<1x128xf32>
    %12 = vector.broadcast %11 : vector<1x128xf32> to vector<16x128xf32>
    %13 = arith.subf %10, %12 : vector<16x128xf32>
    %cst_9 = arith.constant 0.000000e+00 : f32
    %14 = vector.broadcast %cst_9 : f32 to vector<16x128xf32>
    %15 = arith.minimumf %13, %14 : vector<16x128xf32>
    %16 = math.exp %15 : vector<16x128xf32>
    %c0_10 = arith.constant 0 : index
    %c0_11 = arith.constant 0 : index
    %17 = vector.load %arg10[%c0_10, %c0_11] : memref<16x128xf32, #tpu.memory_space<vmem>>, vector<16x128xf32>
    %18 = arith.truncf %16 : vector<16x128xf32> to vector<16x128xbf16>
    %c0_12 = arith.constant 0 : index
    %c0_13 = arith.constant 0 : index
    %19 = vector.load %arg7[%c0_12, %c0_13] : memref<128x128xbf16, #tpu.memory_space<vmem>>, vector<128x128xbf16>
    %cst_14 = arith.constant dense<0.000000e+00> : vector<16x128xf32>
    %20 = tpu.matmul %18, %19, %cst_14 {dimension_numbers = #tpu.dot_dimension_numbers<[1], [0], [0], [1], [0, 0, 1, 1], [], []>} : vector<16x128xbf16>, vector<128x128xbf16>, vector<16x128xf32> -> vector<16x128xf32>
    %21 = arith.addf %17, %20 : vector<16x128xf32>
    %c0_15 = arith.constant 0 : index
    %c0_16 = arith.constant 0 : index
    %22 = vector.load %arg10[%c0_15, %c0_16] : memref<16x128xf32, #tpu.memory_space<vmem>>, vector<16x128xf32>
    tpu.vector_store %arg10[%c0_15, %c0_16], %21 {strides = array<i32>} : memref<16x128xf32, #tpu.memory_space<vmem>>, vector<16x128xf32>,
    %c0_i32_17 = arith.constant 0 : i32
    %23 = arith.cmpi eq, %arg2, %c0_i32_17 : i32
    %24 = arith.extui %23 : i1 to i32
    %c0_i32_18 = arith.constant 0 : i32
    %25 = arith.cmpi ne, %24, %c0_i32_18 : i32
    scf.if %25 {
      %c0_19 = arith.constant 0 : index
      %c0_20 = arith.constant 0 : index
      %26 = vector.load %arg10[%c0_19, %c0_20] : memref<16x128xf32, #tpu.memory_space<vmem>>, vector<16x128xf32>
      %c0_21 = arith.constant 0 : index
      %c0_22 = arith.constant 0 : index
      %27 = vector.load %arg8[%c0_21, %c0_22] : memref<1x128xf32, #tpu.memory_space<vmem>>, vector<1x128xf32>
      %28 = vector.broadcast %27 : vector<1x128xf32> to vector<16x128xf32>
      %29 = arith.addf %26, %28 : vector<16x128xf32>
      %c0_23 = arith.constant 0 : index
      %c0_24 = arith.constant 0 : index
      %30 = vector.load %arg9[%c0_23, %c0_24] : memref<16x128xf32, #tpu.memory_space<vmem>>, vector<16x128xf32>
      tpu.vector_store %arg9[%c0_23, %c0_24], %29 {strides = array<i32>} : memref<16x128xf32, #tpu.memory_space<vmem>>, vector<16x128xf32>,
    } else {
    }
    return
  }
  func.func @transform_0(%arg0: i32, %arg1: i32, %arg2: i32) -> (i32, i32) {
    %c0_i32 = arith.constant 0 : i32
    %c0_i32_0 = arith.constant 0 : i32
    return %arg0, %c0_i32 : i32, i32
  }
  func.func @transform_1(%arg0: i32, %arg1: i32, %arg2: i32) -> (i32, i32) {
    %c0_i32 = arith.constant 0 : i32
    %c0_i32_0 = arith.constant 0 : i32
    return %arg0, %c0_i32 : i32, i32
  }
  func.func @transform_2(%arg0: i32, %arg1: i32, %arg2: i32) -> (i32, i32) {
    %c0_i32 = arith.constant 0 : i32
    %c0_i32_0 = arith.constant 0 : i32
    return %c0_i32, %arg2 : i32, i32
  }
  func.func @transform_3(%arg0: i32, %arg1: i32, %arg2: i32) -> (i32, i32) {
    %c0_i32 = arith.constant 0 : i32
    %c0_i32_0 = arith.constant 0 : i32
    return %c0_i32, %arg2 : i32, i32
  }
  func.func @transform_4(%arg0: i32, %arg1: i32, %arg2: i32) -> (i32, i32) {
    %c0_i32 = arith.constant 0 : i32
    return %arg2, %arg1 : i32, i32
  }
  func.func @transform_5(%arg0: i32, %arg1: i32, %arg2: i32) -> (i32, i32) {
    %c0_i32 = arith.constant 0 : i32
    %c0_i32_0 = arith.constant 0 : i32
    return %c0_i32, %arg1 : i32, i32
  }
  func.func @transform_6(%arg0: i32, %arg1: i32, %arg2: i32) -> (i32, i32) {
    %c0_i32 = arith.constant 0 : i32
    return %arg0, %arg1 : i32, i32
  }
}

</mosaic_0001>

<bundles_post_ra>
// kernel: tpu_custom_call.1
= control target key start
LH: loop header
LB: loop body
LE: loop exit
PB: predicated region body
PF: predicated region fallthrough
CT: control target
= control target key end

     0   :  { %11 = vsyncpa [#allocation4], 0  ;;  %s593_s0 = inlined_call_operand.vmem [shape: f32[16,1], index: 0, kind: input, shape index: {}]   ;;  %s594_s1 = inlined_call_operand.vmem [shape: bf16[16,128], index: 1, kind: input, shape index: {}]   ;;  %s595_s2 = inlined_call_operand.vmem [shape: f32[1,128], index: 2, kind: input, shape index: {}]   ;;  %s596_s3 = inlined_call_operand.hbm [shape: bf16[128,128], index: 3, kind: input, shape index: {}]   ;;  %s597_s4 = inlined_call_operand.hbm [shape: bf16[128,128], index: 4, kind: input, shape index: {}]   ;;  %s598_s5 = inlined_call_operand.vmem [shape: f32[1,128], index: 5, kind: input, shape index: {}]   ;;  %s599_s6 = inlined_call_operand.hbm [shape: f32[16,128], index: 6, kind: output, shape index: {}]  }
   0x1   :  { %12 = vsyncpa [#allocation7], 0 }
   0x2   :  { %13 = vsyncpa [#allocation5], 0  ;;  %s524_s21 = smov [#allocation3]  }
   0x3   :  { %s25_s22 = sshll.u32 %s524_s21, 4  ;;  %s26_s22 = int_to_ptr.vmem [resolvable:$true] %s25_s22 }
   0x4   :  { %s466_s23 = scalar_lea.vmem %s26_s22, 1024  ;;  %p471_p1 = scmp.lt.s32.totalorder %s26_s22, %s26_s22 }
   0x5   :  { %p467_p0 = scmp.ne.s32.totalorder %s26_s22, %s466_s23  ;;  %p472_p2 = scmp.lt.s32.totalorder %s466_s23, %s466_s23 }
   0x7   :  { %p473_p3 = por %p472_p2, %p471_p1 }
   0x9   :  { %p474_p4 = pnand %p473_p3, %p467_p0 }
   0xb   :  { %477 = shalt.err (!%p474_p4)
}
   0xc   :  { %s525_s24 = smov 64   ;;  %s526_s25 = smov 4  }
   0xd   :  { %31 = dma.hbm_to_vmem [thread:$0]  %s596_s3, 1024, %s26_s22, [#allocation4], %s525_s24, %s525_s24, %s526_s25  }
   0xe   :  { %s527_s28 = smov [#allocation6]  }
   0xf   :  { %s37_s29 = sshll.u32 %s527_s28, 4  ;;  %s38_s29 = int_to_ptr.vmem [resolvable:$true] %s37_s29 }
  0x10   :  { %s486_s30 = scalar_lea.vmem %s38_s29, 1024  ;;  %p491_p6 = scmp.lt.s32.totalorder %s38_s29, %s38_s29 }
  0x11   :  { %p487_p5 = scmp.ne.s32.totalorder %s38_s29, %s486_s30  ;;  %p492_p7 = scmp.lt.s32.totalorder %s486_s30, %s486_s30 }
  0x13   :  { %p493_p8 = por %p492_p7, %p491_p6 }
  0x15   :  { %p494_p9 = pnand %p493_p8, %p487_p5 }
  0x17   :  { %497 = shalt.err (!%p494_p9)
}
  0x18   :  { %43 = dma.hbm_to_vmem [thread:$0]  %s597_s4, 1024, %s38_s29, [#allocation7], %s525_s24, %s525_s24, %s526_s25  }
  0x19   :  { %518 = dma.done.wait [#allocation4], 1024  }
  0x1a   :  { %519 = vsyncadd [#allocation4], 4294966272 }
  0x1b   :  { %520 = dma.done.wait [#allocation7], 1024  }
  0x1c   :  { %521 = vsyncadd [#allocation7], 4294966272  ;;  %v528_v0 = vmov 0.0   ;;  %vm529_vm0 = vmmov 0   ;;  %v530_v1 = vmov 0   ;;  %v437_v2 = vld [vmem:[#allocation3 + $0x38] sm:$0xff]  }
  0x1d   :  { %386 = vmatprep.subr.bf16.mxu0 %v528_v0  ;;  %402 = vmatprep.mubr.msk.bf16.mxu0 %vm529_vm0, %v528_v0  ;;  %v438_v3 = vld [vmem:[#allocation3 + $0x30] sm:$0xff]   ;;  %v439_v4 = vld [vmem:[#allocation3 + $0x28] sm:$0xff]   ;;  %v440_v5 = vld [vmem:[#allocation3 + $0x20] sm:$0xff]   ;;  %s531_s14 = smov [#allocation8]  }
  0x1e   :  { %436 = vset.pattern.permute.xlu0 %v530_v1  ;;  %406 = vmatprep.subr.bf16.mxu1 %v528_v0  ;;  %v174_v6 = vld [vmem:[%s593_s0] sm:$0xff]  ;;  %v175_v7 = vld [vmem:[%s593_s0 + $0x8] sm:$0xff]  ;;  %v441_v8 = vld [vmem:[#allocation3 + $0x18] sm:$0xff]   ;;  %s336_s15 = sshll.u32 %s531_s14, 4  ;;  %s337_s15 = int_to_ptr.vmem [resolvable:$true] %s336_s15 }
  0x1f   :  { %422 = vmatprep.mubr.msk.bf16.mxu1 %vm529_vm0, %v528_v0  ;;  %387 = vmatpush3.bf16.msra.mxu0 %v437_v2  ;;  %v442_v9 = vld [vmem:[#allocation3 + $0x10] sm:$0xff]   ;;  %v443_v10 = vld [vmem:[#allocation3 + $0x8] sm:$0xff]   ;;  %v444_v11 = vld [vmem:[#allocation3] sm:$0xff]   ;;  %s498_s16 = scalar_lea.vmem %s337_s15, 256  ;;  %p503_p11 = scmp.lt.s32.totalorder %s337_s15, %s337_s15 }
  0x20   :  { %388 = vmatprep.subr.bf16.mxu0 %v528_v0  ;;  %178 = vperm.xlu0 %436, %v174_v6   ;;  %v445_v12 = vld [vmem:[%s594_s1] sm:$0xff]   ;;  %v446_v13 = vld [vmem:[#allocation6 + $0x38] sm:$0xff]   ;;  %v447_v14 = vld [vmem:[#allocation6 + $0x30] sm:$0xff]   ;;  %p499_p10 = scmp.ne.s32.totalorder %s337_s15, %s498_s16  ;;  %p504_p12 = scmp.lt.s32.totalorder %s498_s16, %s498_s16 }
  0x21   :  { %407 = vmatpush3.bf16.msra.mxu1 %v446_v13  ;;  %v448_v15 = vld [vmem:[#allocation6 + $0x28] sm:$0xff]   ;;  %v449_v16 = vld [vmem:[#allocation6 + $0x20] sm:$0xff]   ;;  %v450_v17 = vld [vmem:[#allocation6 + $0x18] sm:$0xff]  }
  0x22   :  { %408 = vmatprep.subr.bf16.mxu1 %v528_v0  ;;  %v451_v18 = vld [vmem:[#allocation6 + $0x10] sm:$0xff]   ;;  %v452_v19 = vld [vmem:[#allocation6 + $0x8] sm:$0xff]   ;;  %v453_v20 = vld [vmem:[#allocation6] sm:$0xff]   ;;  %p505_p13 = por %p504_p12, %p503_p11 }
  0x23   :  { %389 = vmatpush3.bf16.msra.mxu0 %v438_v3  ;;  %v358_v24 = vld [vmem:[%s595_s2] ss:$0 sm:$0xff] }
  0x24   :  { %390 = vmatprep.subr.bf16.mxu0 %v528_v0  ;;  %183 = vperm.xlu0 %436, %v175_v7   ;;  %v367_v41 = vld [vmem:[%s598_s5] ss:$0 sm:$0xff]  ;;  %p506_p0 = pnand %p505_p13, %p499_p10 }
  0x25   :  { %409 = vmatpush3.bf16.msra.mxu1 %v447_v14 }
  0x26   :  { %410 = vmatprep.subr.bf16.mxu1 %v528_v0 }
  0x27   :  { %391 = vmatpush3.bf16.msra.mxu0 %v439_v4 }
  0x28   :  { %392 = vmatprep.subr.bf16.mxu0 %v528_v0 }
  0x29   :  { %411 = vmatpush3.bf16.msra.mxu1 %v448_v15 }
  0x2a   :  { %412 = vmatprep.subr.bf16.mxu1 %v528_v0 }
  0x2b   :  { %393 = vmatpush3.bf16.msra.mxu0 %v440_v5 }
  0x2c   :  { %394 = vmatprep.subr.bf16.mxu0 %v528_v0 }
  0x2d   :  { %413 = vmatpush3.bf16.msra.mxu1 %v449_v16 }
  0x2e   :  { %414 = vmatprep.subr.bf16.mxu1 %v528_v0 }
  0x2f   :  { %395 = vmatpush3.bf16.msra.mxu0 %v441_v8 }
  0x30   :  { %396 = vmatprep.subr.bf16.mxu0 %v528_v0 }
  0x31   :  { %415 = vmatpush3.bf16.msra.mxu1 %v450_v17 }
  0x32   :  { %416 = vmatprep.subr.bf16.mxu1 %v528_v0 }
  0x33   :  { %397 = vmatpush3.bf16.msra.mxu0 %v442_v9 }
  0x34   :  { %398 = vmatprep.subr.bf16.mxu0 %v528_v0 }
  0x35   :  { %417 = vmatpush3.bf16.msra.mxu1 %v451_v18 }
  0x36   :  { %418 = vmatprep.subr.bf16.mxu1 %v528_v0 }
  0x37   :  { %399 = vmatpush3.bf16.msra.mxu0 %v443_v10 }
  0x38   :  { %400 = vmatprep.subr.bf16.mxu0 %v528_v0 }
  0x39   :  { %419 = vmatpush3.bf16.msra.mxu1 %v452_v19 }
  0x3a   :  { %420 = vmatprep.subr.bf16.mxu1 %v528_v0 }
  0x3b   :  { %401 = vmatpush3.bf16.msra.mxu0 %v444_v11 }
  0x3d   :  { %421 = vmatpush3.bf16.msra.mxu1 %v453_v20 }
  0x3e   :  { %403 = vmatmul.mubr.bf16.vlgmr.msra.gmra.mxu0 %v445_v12 }
  0x9b   :  { %v179_v21 = vpop.permute.xlu0 %178 }
  0x9f   :  { %v184_v30 = vpop.permute.xlu0 %183 }
  0xfe   :  { %v165_v22 = vpop.f32.mrf.mxu0 }
  0xff   :  { %v172_v23 = vmul.f32 0.03125, %v165_v22 }
 0x100   :  { %v404_v25 = vpop.f32.mrf.mxu0 }
 0x101   :  { %v186_v26 = vsub.f32 %v172_v23, %v179_v21 }
 0x102   :  { %v168_v27 = vpop.f32.mrf.mxu0 }
 0x103   :  { %v195_v28 = vsub.f32 %v186_v26, %v358_v24  ;;  %v173_v29 = vmul.f32 0.03125, %v168_v27 }
 0x104   :  { %v405_v31 = vpop.f32.mrf.mxu0 }
 0x105   :  { %v197_v32 = vmin.f32 %v195_v28, 0.0  ;;  %v187_v33 = vsub.f32 %v173_v29, %v184_v30 }
 0x107   :  { %v196_v34 = vsub.f32 %v187_v33, %v358_v24  ;;  %v199_v35 = vmul.f32 1.442695, %v197_v32 }
 0x109   :  { %v198_v36 = vmin.f32 %v196_v34, 0.0  ;;  %454 = vpow2.f32 %v199_v35 }
 0x10b   :  { %v201_v37 = vmul.f32 1.442695, %v198_v36 }
 0x10d   :  { %456 = vpow2.f32 %v201_v37 }
 0x116   :  { %v455_v38 = vpop.eup %454 }
 0x11a   :  { %v457_v39 = vpop.eup %456 }
 0x11b   :  { %v205_v40 = vpack.c.bf16 %v457_v39, %v455_v38 }
 0x11d   :  { %423 = vmatmul.mubr.bf16.vlgmr.msra.gmra.mxu1 %v205_v40 }
 0x1dd   :  { %v304_v42 = vpop.f32.mrf.mxu1 }
 0x1de   :  { %v327_v43 = vadd.f32 %v367_v41, %v304_v42 }
 0x1df   :  { %v424_v44 = vpop.f32.mrf.mxu1 }
 0x1e0   :  { %329 = vst [vmem:[#allocation8] sm:$0xff] %v327_v43 }
 0x1e1   :  { %v307_v45 = vpop.f32.mrf.mxu1 }
 0x1e2   :  { %v328_v46 = vadd.f32 %v367_v41, %v307_v45 }
 0x1e3   :  { %v425_v47 = vpop.f32.mrf.mxu1 }
 0x1e4   :  { %330 = vst [vmem:[#allocation8 + $0x8] sm:$0xff] %v328_v46 }
 0x1e5   :  { %509 = shalt.err (!%p506_p0)
}
 0x1e6   :  { %s532_s17 = smov 128   ;;  %s533_s5 = smov 8  }
 0x1e7   :  { %342 = dma.vmem_to_hbm [thread:$0]  %s337_s15, 256, %s599_s6, [#allocation5], %s532_s17, %s532_s17, %s533_s5  }
 0x1e8   :  { %522 = dma.done.wait [#allocation5], 256  }
 0x1e9   :  { %523 = vsyncadd [#allocation5], 4294967040 }
 0x1ea   :  { %346 = vsyncpa [#allocation4], 1 }
 0x1eb   :  { %347 = vsyncpa [#allocation7], 1 }
 0x1ec   :  { %348 = vsyncpa [#allocation5], 1 }

</bundles_post_ra>
